<compile_context>
chip_gen: v6e
topology: v6e:2x2x1
jax: 0.10.0
libtpu: 0.0.40
codegen_flags: <defaults>
</compile_context>

<pallas_src>
import functools

import jax
import jax.numpy as jnp
from jax.experimental import pallas as pl
from jax.experimental.pallas import tpu as pltpu


def _round_up(n, m):
    return ((n + m - 1) // m) * m


def _classifier_kernel(x_ref, w1_ref, b1_ref, w2_ref, b2_ref, out_ref, *, binary):
    # Linear #1 on the MXU: bf16 operands, f32 accumulation.
    h = jnp.dot(x_ref[...], w1_ref[...], preferred_element_type=jnp.float32)
    h = h + b1_ref[...]                         # bias add in f32

    # Linear #2 (class dim padded to 128 lanes): bf16 operands, f32 accumulation.
    logits = jnp.dot(h.astype(jnp.bfloat16), w2_ref[...],
                     preferred_element_type=jnp.float32)
    logits = logits + b2_ref[...]

    if binary:
        # Sigmoid (num_classes == 2 -> single real output unit; padded lanes
        # are discarded in the wrapper).
        out_ref[...] = 1.0 / (1.0 + jnp.exp(-logits))
    else:
        # Numerically stable softmax over the (padded) class axis. Padded
        # class lanes carry a -1e30 bias -> exp underflows to 0, so the
        # normalization only sees the real classes.
        m = jnp.max(logits, axis=1, keepdims=True)
        e = jnp.exp(logits - m)
        denom = jnp.sum(e, axis=1, keepdims=True)
        out_ref[...] = e * pl.reciprocal(denom, approx=True)


def classifier_forward(x, params, *, num_classes, batch_tile=512):
    """x: [B, C, 28, 28] float32 (NCHW, like the PyTorch module).
    Returns softmax probs [B, num_classes], or sigmoid probs [B] if num_classes == 2."""
    w1, b1, w2, b2 = params
    B = x.shape[0]
    D = x.shape[1] * x.shape[2] * x.shape[3]
    nf = w1.shape[1]
    binary = (num_classes == 2)
    out_dim = 1 if binary else num_classes

    # MXU / lane-aligned padded dims.
    D_pad = _round_up(D, 128)
    NF_pad = _round_up(nf, 128)
    OUT_pad = _round_up(out_dim, 128)

    # Batch tile: multiple of 8 sublanes. For large B this gives a pipelined
    # grid over batch tiles (sized conservatively so double-buffered bf16 x
    # tiles + resident weights stay well under v7x's smaller VMEM budget).
    TB = min(batch_tile, _round_up(B, 8))
    B_pad = _round_up(B, TB)

    # Glue: nn.Flatten() + zero-pad + cast the streaming operands to bf16.
    x_flat = x.reshape(B, D)
    x_p = jnp.zeros((B_pad, D_pad), jnp.bfloat16).at[:B, :D].set(
        x_flat.astype(jnp.bfloat16))

    w1_p = jnp.zeros((D_pad, NF_pad), jnp.bfloat16).at[:D, :nf].set(
        w1.astype(jnp.bfloat16))
    b1_p = jnp.zeros((1, NF_pad), jnp.float32).at[:, :nf].set(
        b1.astype(jnp.float32))
    w2_p = jnp.zeros((NF_pad, OUT_pad), jnp.bfloat16).at[:nf, :out_dim].set(
        w2.astype(jnp.bfloat16))
    # Padded class lanes: -1e30 bias so softmax ignores them (0 for sigmoid).
    b2_fill = 0.0 if binary else -1e30
    b2_p = jnp.full((1, OUT_pad), b2_fill, jnp.float32).at[:, :out_dim].set(
        b2.astype(jnp.float32))

    kernel = functools.partial(_classifier_kernel, binary=binary)

    flops = 2 * B_pad * D_pad * NF_pad + 2 * B_pad * NF_pad * OUT_pad
    bytes_accessed = (x_p.size * 2 + w1_p.size * 2 + w2_p.size * 2
                      + b1_p.size * 4 + b2_p.size * 4 + B_pad * OUT_pad * 4)
    cost = pl.CostEstimate(flops=flops,
                           transcendentals=B_pad * OUT_pad,
                           bytes_accessed=bytes_accessed)

    out = pl.pallas_call(
        kernel,
        out_shape=jax.ShapeDtypeStruct((B_pad, OUT_pad), jnp.float32),
        grid=(B_pad // TB,),
        in_specs=[
            pl.BlockSpec((TB, D_pad), lambda i: (i, 0)),        # x tile (pipelined)
            pl.BlockSpec((D_pad, NF_pad), lambda i: (0, 0)),    # w1 (VMEM-resident)
            pl.BlockSpec((1, NF_pad), lambda i: (0, 0)),        # b1 (resident)
            pl.BlockSpec((NF_pad, OUT_pad), lambda i: (0, 0)),  # w2 (resident)
            pl.BlockSpec((1, OUT_pad), lambda i: (0, 0)),       # b2 (resident)
        ],
        out_specs=pl.BlockSpec((TB, OUT_pad), lambda i: (i, 0)),
        compiler_params=pltpu.CompilerParams(
            dimension_semantics=("parallel",)),
        cost_estimate=cost,
    )(x_p, w1_p, b1_p, w2_p, b2_p)

    # Strip batch / class padding.
    out = out[:B, :out_dim]
    if binary:
        # module does intermediate_outputs[-1].flatten() when shape[1] == 1
        out = out.reshape(B)
    return out
    # TODO(synk): output_feature_maps=True (returning the hidden activations
    # too) is not exposed by this kernel; only the default forward is covered.


def init_params(key, in_dim, nf, out_dim):
    k1, k2, k3, k4 = jax.random.split(key, 4)
    # Deterministic init mimicking torch.nn.Linear's uniform(-1/sqrt(fan_in), ...)
    lim1 = 1.0 / jnp.sqrt(in_dim)
    lim2 = 1.0 / jnp.sqrt(nf)
    w1 = jax.random.uniform(k1, (in_dim, nf), jnp.float32, -lim1, lim1)
    b1 = jax.random.uniform(k2, (1, nf), jnp.float32, -lim1, lim1)
    w2 = jax.random.uniform(k3, (nf, out_dim), jnp.float32, -lim2, lim2)
    b2 = jax.random.uniform(k4, (1, out_dim), jnp.float32, -lim2, lim2)
    return w1, b1, w2, b2


if __name__ == "__main__":
    # Module-consistent small shapes: img_size=(1, 28, 28), num_classes=10, nf=32
    B, C, H, W = 2, 1, 28, 28
    num_classes = 10
    nf = 32
    in_dim = C * H * W
    out_dim = 1 if num_classes == 2 else num_classes

    key = jax.random.PRNGKey(0)
    kx, kp = jax.random.split(key)
    x = jax.random.normal(kx, (B, C, H, W), jnp.float32)
    params = init_params(kp, in_dim, nf, out_dim)

    out = classifier_forward(x, params, num_classes=num_classes)
    out = jax.block_until_ready(out)

    # Reference in plain JAX with matching bf16-operand / f32-accum precision.
    w1, b1, w2, b2 = params
    x_flat = x.reshape(B, -1)
    h_ref = jnp.dot(x_flat.astype(jnp.bfloat16), w1.astype(jnp.bfloat16),
                    preferred_element_type=jnp.float32) + b1
    logits_ref = jnp.dot(h_ref.astype(jnp.bfloat16), w2.astype(jnp.bfloat16),
                         preferred_element_type=jnp.float32) + b2
    ref = jax.nn.softmax(logits_ref, axis=1)

    assert out.shape == (B, num_classes)
    assert jnp.allclose(out, ref, atol=5e-3), "mismatch vs JAX reference"
    assert jnp.all(jnp.abs(jnp.sum(out, axis=1) - 1.0) < 5e-3), "rows not normalized"

    print("KERNEL_OK")
</pallas_src>

<mosaic_0001>
module attributes {stable_mosaic.version = 11 : i64} {
  func.func @_classifier_kernel(%arg0: i32, %arg1: memref<8x896xbf16, #tpu.memory_space<vmem>>, %arg2: memref<896x128xbf16, #tpu.memory_space<vmem>>, %arg3: memref<1x128xf32, #tpu.memory_space<vmem>>, %arg4: memref<128x128xbf16, #tpu.memory_space<vmem>>, %arg5: memref<1x128xf32, #tpu.memory_space<vmem>>, %arg6: memref<8x128xf32, #tpu.memory_space<vmem>>) attributes {dimension_semantics = [#tpu.dimension_semantics<parallel>], iteration_bounds = array<i64: 1>, scalar_prefetch = 0 : i64, scratch_operands = 0 : i64, tpu.core_type = #tpu.core_type<tc>, window_params = [{transform_indices = @transform_0, window_bounds = array<i64: 8, 896>}, {pipeline_mode = #tpu.pipeline_mode<synchronous>, transform_indices = @transform_1, window_bounds = array<i64: 896, 128>}, {pipeline_mode = #tpu.pipeline_mode<synchronous>, transform_indices = @transform_2, window_bounds = array<i64: 1, 128>}, {pipeline_mode = #tpu.pipeline_mode<synchronous>, transform_indices = @transform_3, window_bounds = array<i64: 128, 128>}, {pipeline_mode = #tpu.pipeline_mode<synchronous>, transform_indices = @transform_4, window_bounds = array<i64: 1, 128>}, {transform_indices = @transform_5, window_bounds = array<i64: 8, 128>}]} {
    %c0 = arith.constant 0 : index
    %c0_0 = arith.constant 0 : index
    %0 = vector.load %arg1[%c0, %c0_0] : memref<8x896xbf16, #tpu.memory_space<vmem>>, vector<8x896xbf16>
    %c0_1 = arith.constant 0 : index
    %c0_2 = arith.constant 0 : index
    %1 = vector.load %arg2[%c0_1, %c0_2] : memref<896x128xbf16, #tpu.memory_space<vmem>>, vector<896x128xbf16>
    %cst = arith.constant dense<0.000000e+00> : vector<8x128xf32>
    %2 = tpu.matmul %0, %1, %cst {dimension_numbers = #tpu.dot_dimension_numbers<[1], [0], [0], [1], [0, 0, 1, 1], [], []>} : vector<8x896xbf16>, vector<896x128xbf16>, vector<8x128xf32> -> vector<8x128xf32>
    %c0_3 = arith.constant 0 : index
    %c0_4 = arith.constant 0 : index
    %3 = vector.load %arg3[%c0_3, %c0_4] : memref<1x128xf32, #tpu.memory_space<vmem>>, vector<1x128xf32>
    %4 = vector.broadcast %3 : vector<1x128xf32> to vector<8x128xf32>
    %5 = arith.addf %2, %4 : vector<8x128xf32>
    %6 = arith.truncf %5 : vector<8x128xf32> to vector<8x128xbf16>
    %c0_5 = arith.constant 0 : index
    %c0_6 = arith.constant 0 : index
    %7 = vector.load %arg4[%c0_5, %c0_6] : memref<128x128xbf16, #tpu.memory_space<vmem>>, vector<128x128xbf16>
    %cst_7 = arith.constant dense<0.000000e+00> : vector<8x128xf32>
    %8 = tpu.matmul %6, %7, %cst_7 {dimension_numbers = #tpu.dot_dimension_numbers<[1], [0], [0], [1], [0, 0, 1, 1], [], []>} : vector<8x128xbf16>, vector<128x128xbf16>, vector<8x128xf32> -> vector<8x128xf32>
    %c0_8 = arith.constant 0 : index
    %c0_9 = arith.constant 0 : index
    %9 = vector.load %arg5[%c0_8, %c0_9] : memref<1x128xf32, #tpu.memory_space<vmem>>, vector<1x128xf32>
    %10 = vector.broadcast %9 : vector<1x128xf32> to vector<8x128xf32>
    %11 = arith.addf %8, %10 : vector<8x128xf32>
    %cst_10 = arith.constant dense<0xFF800000> : vector<8xf32>
    %12 = vector.multi_reduction <maximumf>, %11, %cst_10 [1] : vector<8x128xf32> to vector<8xf32>
    %13 = vector.shape_cast %12 : vector<8xf32> to vector<8x1xf32>
    %14 = vector.broadcast %13 : vector<8x1xf32> to vector<8x128xf32>
    %15 = arith.subf %11, %14 : vector<8x128xf32>
    %16 = math.exp %15 : vector<8x128xf32>
    %cst_11 = arith.constant dense<0.000000e+00> : vector<8xf32>
    %17 = vector.multi_reduction <add>, %16, %cst_11 [1] : vector<8x128xf32> to vector<8xf32>
    %18 = vector.shape_cast %17 : vector<8xf32> to vector<8x1xf32>
    %19 = tpu.reciprocal %18 {approx = true} : vector<8x1xf32> -> vector<8x1xf32>
    %20 = vector.broadcast %19 : vector<8x1xf32> to vector<8x128xf32>
    %21 = arith.mulf %16, %20 : vector<8x128xf32>
    %c0_12 = arith.constant 0 : index
    %c0_13 = arith.constant 0 : index
    %22 = vector.load %arg6[%c0_12, %c0_13] : memref<8x128xf32, #tpu.memory_space<vmem>>, vector<8x128xf32>
    tpu.vector_store %arg6[%c0_12, %c0_13], %21 {strides = array<i32>} : memref<8x128xf32, #tpu.memory_space<vmem>>, vector<8x128xf32>,
    return
  }
  func.func @transform_0(%arg0: i32) -> (i32, i32) {
    %c0_i32 = arith.constant 0 : i32
    %c0_i32_0 = arith.constant 0 : i32
    return %arg0, %c0_i32 : i32, i32
  }
  func.func @transform_1(%arg0: i32) -> (i32, i32) {
    %c0_i32 = arith.constant 0 : i32
    %c0_i32_0 = arith.constant 0 : i32
    %c0_i32_1 = arith.constant 0 : i32
    return %c0_i32, %c0_i32_0 : i32, i32
  }
  func.func @transform_2(%arg0: i32) -> (i32, i32) {
    %c0_i32 = arith.constant 0 : i32
    %c0_i32_0 = arith.constant 0 : i32
    %c0_i32_1 = arith.constant 0 : i32
    return %c0_i32, %c0_i32_0 : i32, i32
  }
  func.func @transform_3(%arg0: i32) -> (i32, i32) {
    %c0_i32 = arith.constant 0 : i32
    %c0_i32_0 = arith.constant 0 : i32
    %c0_i32_1 = arith.constant 0 : i32
    return %c0_i32, %c0_i32_0 : i32, i32
  }
  func.func @transform_4(%arg0: i32) -> (i32, i32) {
    %c0_i32 = arith.constant 0 : i32
    %c0_i32_0 = arith.constant 0 : i32
    %c0_i32_1 = arith.constant 0 : i32
    return %c0_i32, %c0_i32_0 : i32, i32
  }
  func.func @transform_5(%arg0: i32) -> (i32, i32) {
    %c0_i32 = arith.constant 0 : i32
    %c0_i32_0 = arith.constant 0 : i32
    return %arg0, %c0_i32 : i32, i32
  }
}

</mosaic_0001>

<bundles_post_ra>
// kernel: tpu_custom_call.1
= control target key start
LH: loop header
LB: loop body
LE: loop exit
PB: predicated region body
PF: predicated region fallthrough
CT: control target
= control target key end

     0   :  { %10 = vsyncpa [#allocation3], 0  ;;  %s1285_s0 = inlined_call_operand.hbm [shape: bf16[8,896], index: 0, kind: input, shape index: {}]   ;;  %s1286_s1 = inlined_call_operand.hbm [shape: bf16[896,128], index: 1, kind: input, shape index: {}]   ;;  %s1287_s2 = inlined_call_operand.vmem [shape: f32[1,128], index: 2, kind: input, shape index: {}]   ;;  %s1288_s3 = inlined_call_operand.hbm [shape: bf16[128,128], index: 3, kind: input, shape index: {}]   ;;  %s1289_s4 = inlined_call_operand.vmem [shape: f32[1,128], index: 4, kind: input, shape index: {}]   ;;  %s1290_s5 = inlined_call_operand.hbm [shape: f32[8,128], index: 5, kind: output, shape index: {}]  }
   0x1   :  { %11 = vsyncpa [#allocation6], 0 }
   0x2   :  { %12 = vsyncpa [#allocation4], 0  ;;  %s1209_s18 = smov [#allocation5]  }
   0x3   :  { %s28_s19 = sshll.u32 %s1209_s18, 4  ;;  %s29_s19 = int_to_ptr.vmem [resolvable:$true] %s28_s19 }
   0x4   :  { %s1131_s20 = scalar_lea.vmem %s29_s19, 7168  ;;  %p1136_p1 = scmp.lt.s32.totalorder %s29_s19, %s29_s19 }
   0x5   :  { %p1132_p0 = scmp.ne.s32.totalorder %s29_s19, %s1131_s20  ;;  %p1137_p2 = scmp.lt.s32.totalorder %s1131_s20, %s1131_s20 }
   0x7   :  { %p1138_p3 = por %p1137_p2, %p1136_p1 }
   0x9   :  { %p1139_p4 = pnand %p1138_p3, %p1132_p0 }
   0xb   :  { %1142 = shalt.err (!%p1139_p4)
}
   0xc   :  { %s1210_s21 = smov 64   ;;  %s1211_s22 = smov 4  }
   0xd   :  { %34 = dma.hbm_to_vmem [thread:$0]  %s1286_s1, 7168, %s29_s19, [#allocation6], %s1210_s21, %s1210_s21, %s1211_s22  }
   0xe   :  { %s1212_s25 = smov [#allocation2]   ;;  %s1213_s27 = smov [#allocation7]  }
   0xf   :  { %s19_s26 = sshll.u32 %s1212_s25, 4  ;;  %s42_s28 = sshll.u32 %s1213_s27, 4  ;;  %s20_s26 = int_to_ptr.vmem [resolvable:$true] %s19_s26  ;;  %s43_s28 = int_to_ptr.vmem [resolvable:$true] %s42_s28 }
  0x10   :  { %s1151_s29 = scalar_lea.vmem %s20_s26, 448  ;;  %p1156_p6 = scmp.lt.s32.totalorder %s20_s26, %s20_s26 }
  0x11   :  { %p1152_p5 = scmp.ne.s32.totalorder %s20_s26, %s1151_s29  ;;  %p1157_p7 = scmp.lt.s32.totalorder %s1151_s29, %s1151_s29 }
  0x13   :  { %p1158_p8 = por %p1157_p7, %p1156_p6 }
  0x15   :  { %p1159_p9 = pnand %p1158_p8, %p1152_p5 }
  0x17   :  { %1162 = shalt.err (!%p1159_p9)
}
  0x18   :  { %22 = dma.hbm_to_vmem [thread:$0]  %s1285_s0, 448, %s20_s26, [#allocation3]  }
  0x19   :  { %s1171_s7 = scalar_lea.vmem %s43_s28, 1024  ;;  %p1176_p11 = scmp.lt.s32.totalorder %s43_s28, %s43_s28 }
  0x1a   :  { %p1172_p10 = scmp.ne.s32.totalorder %s43_s28, %s1171_s7  ;;  %p1177_p12 = scmp.lt.s32.totalorder %s1171_s7, %s1171_s7 }
  0x1c   :  { %p1178_p13 = por %p1177_p12, %p1176_p11 }
  0x1e   :  { %p1179_p0 = pnand %p1178_p13, %p1172_p10 }
  0x20   :  { %1182 = shalt.err (!%p1179_p0)
}
  0x21   :  { %48 = dma.hbm_to_vmem [thread:$0]  %s1288_s3, 1024, %s43_s28, [#allocation6], %s1210_s21, %s1210_s21, %s1211_s22  }
  0x22   :  { %1203 = dma.done.wait [#allocation3], 448  }
  0x23   :  { %1204 = vsyncadd [#allocation3], 4294966848 }
  0x24   :  { %1205 = dma.done.wait [#allocation6], 8192  }
  0x25   :  { %1206 = vsyncadd [#allocation6], 4294959104  ;;  %v1048_v0 = vld [vmem:[#allocation5 + $0x78] sm:$0xff]   ;;  %v1052_v4 = vld [vmem:[#allocation5 + $0x70] sm:$0xff]   ;;  %v1214_v39 = vmov 0.0   ;;  %vm1215_vm0 = vmmov 0  }
  0x26   :  { %v1049_v1 = vld [vmem:[#allocation5 + $0xf8] sm:$0xff]   ;;  %916 = vmatprep.subr.bf16.mxu0 %v1048_v0  ;;  %v1053_v5 = vld [vmem:[#allocation5 + $0xf0] sm:$0xff]   ;;  %v1056_v8 = vld [vmem:[#allocation5 + $0x68] sm:$0xff]  }
  0x27   :  { %v1050_v2 = vld [vmem:[#allocation5 + $0x38] sm:$0xff]   ;;  %938 = vmatprep.subr.bf16.mxu1 %v1049_v1  ;;  %v1054_v6 = vld [vmem:[#allocation5 + $0x30] sm:$0xff]   ;;  %v1057_v9 = vld [vmem:[#allocation5 + $0xe8] sm:$0xff]  }
  0x28   :  { %v1051_v3 = vld [vmem:[#allocation5 + $0xb8] sm:$0xff]   ;;  %917 = vmatpush3.bf16.msra.mxu0 %v1050_v2  ;;  %v1055_v7 = vld [vmem:[#allocation5 + $0xb0] sm:$0xff]   ;;  %v1058_v10 = vld [vmem:[#allocation5 + $0x28] sm:$0xff]  }
  0x29   :  { %939 = vmatpush3.bf16.msra.mxu1 %v1051_v3  ;;  %918 = vmatprep.subr.bf16.mxu0 %v1052_v4  ;;  %v1059_v11 = vld [vmem:[#allocation5 + $0xa8] sm:$0xff]   ;;  %v1060_v12 = vld [vmem:[#allocation5 + $0x60] sm:$0xff]   ;;  %v1064_v16 = vld [vmem:[#allocation5 + $0x58] sm:$0xff]  }
  0x2a   :  { %940 = vmatprep.subr.bf16.mxu1 %v1053_v5  ;;  %v1061_v13 = vld [vmem:[#allocation5 + $0xe0] sm:$0xff]   ;;  %v1065_v17 = vld [vmem:[#allocation5 + $0xd8] sm:$0xff]   ;;  %v1068_v20 = vld [vmem:[#allocation5 + $0x50] sm:$0xff]  }
  0x2b   :  { %v1062_v14 = vld [vmem:[#allocation5 + $0x20] sm:$0xff]   ;;  %v1066_v18 = vld [vmem:[#allocation5 + $0x18] sm:$0xff]   ;;  %v1069_v21 = vld [vmem:[#allocation5 + $0xd0] sm:$0xff]  }
  0x2c   :  { %919 = vmatpush3.bf16.msra.mxu0 %v1054_v6  ;;  %v1063_v15 = vld [vmem:[#allocation5 + $0xa0] sm:$0xff]   ;;  %v1067_v19 = vld [vmem:[#allocation5 + $0x98] sm:$0xff]   ;;  %v1070_v22 = vld [vmem:[#allocation5 + $0x10] sm:$0xff]  }
  0x2d   :  { %941 = vmatpush3.bf16.msra.mxu1 %v1055_v7  ;;  %920 = vmatprep.subr.bf16.mxu0 %v1056_v8  ;;  %v1071_v23 = vld [vmem:[#allocation5 + $0x90] sm:$0xff]   ;;  %v1072_v24 = vld [vmem:[#allocation5 + $0x48] sm:$0xff]   ;;  %v1076_v28 = vld [vmem:[#allocation5 + $0x40] sm:$0xff]  }
  0x2e   :  { %942 = vmatprep.subr.bf16.mxu1 %v1057_v9  ;;  %v1073_v25 = vld [vmem:[#allocation5 + $0xc8] sm:$0xff]   ;;  %v1077_v29 = vld [vmem:[#allocation5 + $0xc0] sm:$0xff]   ;;  %v1084_v38 = vld [vmem:[#allocation5 + $0x178] sm:$0xff]  }
  0x2f   :  { %v1074_v26 = vld [vmem:[#allocation5 + $0x8] sm:$0xff]   ;;  %v1078_v30 = vld [vmem:[#allocation5] sm:$0xff]   ;;  %v1085_v40 = vld [vmem:[#allocation5 + $0x138] sm:$0xff]  }
  0x30   :  { %921 = vmatpush3.bf16.msra.mxu0 %v1058_v10  ;;  %v1075_v27 = vld [vmem:[#allocation5 + $0x88] sm:$0xff]   ;;  %v1079_v31 = vld [vmem:[#allocation5 + $0x80] sm:$0xff]   ;;  %v1086_v41 = vld [vmem:[#allocation5 + $0x1b8] sm:$0xff]  }
  0x31   :  { %943 = vmatpush3.bf16.msra.mxu1 %v1059_v11  ;;  %922 = vmatprep.subr.bf16.mxu0 %v1060_v12  ;;  %v61_v32 = vld [vmem:[#allocation2] sm:$0xff]  ;;  %v62_v33 = vld [vmem:[#allocation2 + $0x8] sm:$0xff]  ;;  %v1096_v51 = vld [vmem:[#allocation5 + $0x158] sm:$0xff]  }
  0x32   :  { %944 = vmatprep.subr.bf16.mxu1 %v1061_v13  ;;  %v844_v34 = vcombine.low %v61_v32, %v61_v32  ;;  %v845_v35 = vcombine.high %v61_v32, %v61_v32  ;;  %v846_v36 = vcombine.low %v62_v33, %v62_v33  ;;  %v847_v37 = vcombine.high %v62_v33, %v62_v33  ;;  %v1087_v42 = vld [vmem:[#allocation5 + $0x170] sm:$0xff]   ;;  %v1090_v45 = vld [vmem:[#allocation5 + $0x168] sm:$0xff]   ;;  %v1093_v48 = vld [vmem:[#allocation5 + $0x160] sm:$0xff]  }
  0x33   :  { %v1088_v43 = vld [vmem:[#allocation5 + $0x130] sm:$0xff]   ;;  %v1091_v46 = vld [vmem:[#allocation5 + $0x128] sm:$0xff]   ;;  %v1094_v49 = vld [vmem:[#allocation5 + $0x120] sm:$0xff]  }
  0x34   :  { %923 = vmatpush3.bf16.msra.mxu0 %v1062_v14  ;;  %577 = vmatprep.mubr.bf16.mxu0 %v845_v35  ;;  %v1089_v44 = vld [vmem:[#allocation5 + $0x1b0] sm:$0xff]   ;;  %v1092_v47 = vld [vmem:[#allocation5 + $0x1a8] sm:$0xff]   ;;  %v1095_v50 = vld [vmem:[#allocation5 + $0x1a0] sm:$0xff]  }
  0x35   :  { %945 = vmatpush3.bf16.msra.mxu1 %v1063_v15  ;;  %924 = vmatprep.subr.bf16.mxu0 %v1064_v16  ;;  %v1097_v52 = vld [vmem:[#allocation5 + $0x118] sm:$0xff]   ;;  %v1099_v54 = vld [vmem:[#allocation5 + $0x150] sm:$0xff]   ;;  %v1102_v57 = vld [vmem:[#allocation5 + $0x148] sm:$0xff]  }
  0x36   :  { %946 = vmatprep.subr.bf16.mxu1 %v1065_v17  ;;  %617 = vmatprep.mubr.bf16.mxu1 %v847_v37  ;;  %v1098_v53 = vld [vmem:[#allocation5 + $0x198] sm:$0xff]   ;;  %v1100_v55 = vld [vmem:[#allocation5 + $0x110] sm:$0xff]   ;;  %v1103_v58 = vld [vmem:[#allocation5 + $0x108] sm:$0xff]  }
  0x37   :  { %v1101_v56 = vld [vmem:[#allocation5 + $0x190] sm:$0xff]   ;;  %v1104_v59 = vld [vmem:[#allocation5 + $0x188] sm:$0xff]   ;;  %v1105_v61 = vld [vmem:[#allocation5 + $0x140] sm:$0xff]  }
  0x38   :  { %925 = vmatpush3.bf16.msra.mxu0 %v1066_v18  ;;  %v63_v60 = vld [vmem:[#allocation2 + $0x10] sm:$0xff]  ;;  %v1106_v63 = vld [vmem:[#allocation5 + $0x100] sm:$0xff]   ;;  %v1110_v2 = vld [vmem:[#allocation2 + $0x18] ss:$0 sps:$4 sm:$0xff]  }
  0x39   :  { %947 = vmatpush3.bf16.msra.mxu1 %v1067_v19  ;;  %926 = vmatprep.subr.bf16.mxu0 %v1068_v20  ;;  %v849_v62 = vcombine.high %v63_v60, %v63_v60  ;;  %v1107_v0 = vld [vmem:[#allocation5 + $0x180] sm:$0xff]   ;;  %v848_v1 = vcombine.low %v63_v60, %v63_v60  ;;  %v1111_v3 = vld [vmem:[#allocation7 + $0x38] sm:$0xff]   ;;  %v1112_v4 = vld [vmem:[#allocation7 + $0x30] sm:$0xff]  }
  0x3a   :  { %948 = vmatprep.subr.bf16.mxu1 %v1069_v21  ;;  %v1113_v5 = vld [vmem:[#allocation7 + $0x28] sm:$0xff]   ;;  %v1114_v6 = vld [vmem:[#allocation7 + $0x20] sm:$0xff]   ;;  %v1115_v7 = vld [vmem:[#allocation7 + $0x18] sm:$0xff]  }
  0x3b   :  { %v1116_v8 = vld [vmem:[#allocation7 + $0x10] sm:$0xff]   ;;  %v1117_v9 = vld [vmem:[#allocation7 + $0x8] sm:$0xff]   ;;  %v1118_v10 = vld [vmem:[#allocation7] sm:$0xff]  }
  0x3c   :  { %927 = vmatpush3.bf16.msra.mxu0 %v1070_v22  ;;  %v843_v20 = vld [vmem:[%s1287_s2] ss:$0 sm:$0xff]  ;;  %s1216_s2 = smov [#allocation8]  }
  0x3d   :  { %949 = vmatpush3.bf16.msra.mxu1 %v1071_v23  ;;  %928 = vmatprep.subr.bf16.mxu0 %v1072_v24  ;;  %s833_s11 = sshll.u32 %s1216_s2, 4  ;;  %s834_s11 = int_to_ptr.vmem [resolvable:$true] %s833_s11 }
  0x3e   :  { %950 = vmatprep.subr.bf16.mxu1 %v1073_v25  ;;  %p1188_p2 = scmp.lt.s32.totalorder %s834_s11, %s834_s11 }
  0x40   :  { %929 = vmatpush3.bf16.msra.mxu0 %v1074_v26 }
  0x41   :  { %951 = vmatpush3.bf16.msra.mxu1 %v1075_v27  ;;  %930 = vmatprep.subr.bf16.mxu0 %v1076_v28 }
  0x42   :  { %952 = vmatprep.subr.bf16.mxu1 %v1077_v29 }
  0x44   :  { %931 = vmatpush3.bf16.msra.mxu0 %v1078_v30 }
  0x45   :  { %953 = vmatpush3.bf16.msra.mxu1 %v1079_v31  ;;  %960 = vmatprep.subr.bf16.mxu0 %v1084_v38 }
  0x46   :  { %1000 = vmatprep.subr.bf16.mxu1 %v1214_v39 }
  0x47   :  { %578 = vmatmul.mubr.bf16.vlgmr.msra.gmra.mxu0 %v844_v34 }
  0x48   :  { %618 = vmatmul.mubr.bf16.vlgmr.msra.gmra.mxu1 %v846_v36  ;;  %961 = vmatpush3.bf16.msra.mxu0 %v1085_v40  ;;  %v907_v36 = vld [vmem:[%s1289_s4] ss:$0 sm:$0xff]  ;;  %s1183_s4 = scalar_lea.vmem %s834_s11, 128 }
  0x49   :  { %1001 = vmatpush3.bf16.msra.mxu1 %v1086_v41  ;;  %962 = vmatprep.subr.bf16.mxu0 %v1087_v42  ;;  %p1184_p1 = scmp.ne.s32.totalorder %s834_s11, %s1183_s4  ;;  %p1189_p3 = scmp.lt.s32.totalorder %s1183_s4, %s1183_s4 }
  0x4a   :  { %1002 = vmatprep.subr.bf16.mxu1 %v1214_v39  ;;  %1016 = vmatprep.mubr.msk.bf16.mxu1 %vm1215_vm0, %v1214_v39 }
  0x4b   :  { %657 = vmatprep.mubr.bf16.mxu0 %v849_v62  ;;  %p1190_p4 = por %p1189_p3, %p1188_p2 }
  0x4c   :  { %963 = vmatpush3.bf16.msra.mxu0 %v1088_v43 }
  0x4d   :  { %1003 = vmatpush3.bf16.msra.mxu1 %v1089_v44  ;;  %964 = vmatprep.subr.bf16.mxu0 %v1090_v45  ;;  %p1191_p5 = pnand %p1190_p4, %p1184_p1 }
  0x4e   :  { %1004 = vmatprep.subr.bf16.mxu1 %v1214_v39 }
  0x50   :  { %965 = vmatpush3.bf16.msra.mxu0 %v1091_v46 }
  0x51   :  { %1005 = vmatpush3.bf16.msra.mxu1 %v1092_v47  ;;  %966 = vmatprep.subr.bf16.mxu0 %v1093_v48 }
  0x52   :  { %1006 = vmatprep.subr.bf16.mxu1 %v1214_v39 }
  0x54   :  { %967 = vmatpush3.bf16.msra.mxu0 %v1094_v49 }
  0x55   :  { %1007 = vmatpush3.bf16.msra.mxu1 %v1095_v50  ;;  %968 = vmatprep.subr.bf16.mxu0 %v1096_v51 }
  0x56   :  { %1008 = vmatprep.subr.bf16.mxu1 %v1214_v39 }
  0x58   :  { %969 = vmatpush3.bf16.msra.mxu0 %v1097_v52 }
  0x59   :  { %1009 = vmatpush3.bf16.msra.mxu1 %v1098_v53  ;;  %970 = vmatprep.subr.bf16.mxu0 %v1099_v54 }
  0x5a   :  { %1010 = vmatprep.subr.bf16.mxu1 %v1214_v39 }
  0x5c   :  { %971 = vmatpush3.bf16.msra.mxu0 %v1100_v55 }
  0x5d   :  { %1011 = vmatpush3.bf16.msra.mxu1 %v1101_v56  ;;  %972 = vmatprep.subr.bf16.mxu0 %v1102_v57 }
  0x5e   :  { %1012 = vmatprep.subr.bf16.mxu1 %v1214_v39 }
  0x60   :  { %973 = vmatpush3.bf16.msra.mxu0 %v1103_v58 }
  0x61   :  { %1013 = vmatpush3.bf16.msra.mxu1 %v1104_v59  ;;  %974 = vmatprep.subr.bf16.mxu0 %v1105_v61 }
  0x62   :  { %1014 = vmatprep.subr.bf16.mxu1 %v1214_v39 }
  0x64   :  { %975 = vmatpush3.bf16.msra.mxu0 %v1106_v63 }
  0x65   :  { %1015 = vmatpush3.bf16.msra.mxu1 %v1107_v0  ;;  %1020 = vmatprep.subr.bf16.mxu0 %v1214_v39 }
  0x67   :  { %658 = vmatmul.mubr.bf16.vlgmr.msra.gmra.mxu0 %v848_v1 }
  0x68   :  { %1017 = vmatmul.mubr.bf16.vlgmr.msra.gmra.mxu1 %v1110_v2  ;;  %1036 = vmatprep.mubr.msk.bf16.mxu0 %vm1215_vm0, %v1214_v39 }
  0x69   :  { %1021 = vmatpush3.bf16.msra.mxu0 %v1111_v3 }
  0x6a   :  { %1022 = vmatprep.subr.bf16.mxu0 %v1214_v39 }
  0x6d   :  { %1023 = vmatpush3.bf16.msra.mxu0 %v1112_v4 }
  0x6e   :  { %1024 = vmatprep.subr.bf16.mxu0 %v1214_v39 }
  0x71   :  { %1025 = vmatpush3.bf16.msra.mxu0 %v1113_v5 }
  0x72   :  { %1026 = vmatprep.subr.bf16.mxu0 %v1214_v39 }
  0x75   :  { %1027 = vmatpush3.bf16.msra.mxu0 %v1114_v6 }
  0x76   :  { %1028 = vmatprep.subr.bf16.mxu0 %v1214_v39 }
  0x79   :  { %1029 = vmatpush3.bf16.msra.mxu0 %v1115_v7 }
  0x7a   :  { %1030 = vmatprep.subr.bf16.mxu0 %v1214_v39 }
  0x7d   :  { %1031 = vmatpush3.bf16.msra.mxu0 %v1116_v8 }
  0x7e   :  { %1032 = vmatprep.subr.bf16.mxu0 %v1214_v39 }
  0x81   :  { %1033 = vmatpush3.bf16.msra.mxu0 %v1117_v9 }
  0x82   :  { %1034 = vmatprep.subr.bf16.mxu0 %v1214_v39 }
  0x85   :  { %1035 = vmatpush3.bf16.msra.mxu0 %v1118_v10 }
 0x107   :  { %v932_v11 = vpop.f32.mrf.mxu0 }
 0x108   :  { %v954_v12 = vpop.f32.mrf.mxu1 }
 0x109   :  { %v933_v13 = vpop.f32.mrf.mxu0 }
 0x10a   :  { %v955_v14 = vpop.f32.mrf.mxu1  ;;  %v934_v19 = vadd.f32 %v933_v13, %v932_v11 }
 0x10b   :  { %v935_v15 = vpop.f32.mrf.mxu0  ;;  %v956_v22 = vadd.f32 %v955_v14, %v954_v12 }
 0x10c   :  { %v957_v16 = vpop.f32.mrf.mxu1  ;;  %v580_v21 = vadd.f32 %v934_v19, %v843_v20 }
 0x10d   :  { %v936_v17 = vpop.f32.mrf.mxu0 }
 0x10e   :  { %v958_v18 = vpop.f32.mrf.mxu1  ;;  %v620_v26 = vadd.f32 %v956_v22, %v580_v21 }
 0x127   :  { %v976_v23 = vpop.f32.mrf.mxu0 }
 0x128   :  { %v699_v24 = vpop.f32.mrf.mxu1 }
 0x129   :  { %v977_v25 = vpop.f32.mrf.mxu0 }
 0x12a   :  { %v978_v27 = vadd.f32 %v977_v25, %v976_v23  ;;  %v1018_v28 = vpop.f32.mrf.mxu1 }
 0x12b   :  { %v979_v29 = vpop.f32.mrf.mxu0 }
 0x12c   :  { %v660_v30 = vadd.f32 %v978_v27, %v620_v26  ;;  %v702_v31 = vpop.f32.mrf.mxu1 }
 0x12d   :  { %v980_v32 = vpop.f32.mrf.mxu0 }
 0x12e   :  { %v700_v33 = vadd.f32 %v699_v24, %v660_v30  ;;  %v1019_v34 = vpop.f32.mrf.mxu1 }
 0x130   :  { %v705_v35 = vpack.c.bf16 %v700_v33, %v700_v33 }
 0x132   :  { %1037 = vmatmul.mubr.bf16.vlgmr.msra.gmra.mxu0 %v705_v35 }
 0x1f2   :  { %v811_v37 = vpop.f32.mrf.mxu0 }
 0x1f3   :  { %v812_v38 = vadd.f32 %v907_v36, %v811_v37 }
 0x1f4   :  { %v1038_v39 = vpop.f32.mrf.mxu0 }
 0x1f5   :  { %817 = vmax.xlane.f32.xlu0 %v812_v38 }
 0x1f6   :  { %v814_v40 = vpop.f32.mrf.mxu0 }
 0x1f8   :  { %v1039_v41 = vpop.f32.mrf.mxu0 }
 0x27e   :  { %v818_v42 = vpop.xlane.xlu0 %817 }
 0x27f   :  { %v819_v43 = vsub.f32 %v812_v38, %v818_v42 }
 0x281   :  { %v820_v44 = vmul.f32 1.442695, %v819_v43 }
 0x283   :  { %1119 = vpow2.f32 %v820_v44 }
 0x290   :  { %v1120_v45 = vpop.eup %1119 }
 0x291   :  { %822 = vadd.xlane.f32.xlu0 %v1120_v45 }
 0x31a   :  { %v823_v46 = vpop.xlane.xlu0 %822 }
 0x31b   :  { %1121 = vrcp.f32 %v823_v46 }
 0x328   :  { %v1122_v47 = vpop.eup %1121 }
 0x329   :  { %v825_v48 = vmul.f32 %v1122_v47, %v1120_v45 }
 0x32b   :  { %826 = vst [vmem:[#allocation8] sm:$0xff] %v825_v48 }
 0x32c   :  { %1194 = shalt.err (!%p1191_p5)
}
 0x32d   :  { %836 = dma.vmem_to_hbm [thread:$0]  %s834_s11, 128, %s1290_s5, [#allocation4]  }
 0x32e   :  { %1207 = dma.done.wait [#allocation4], 128  }
 0x32f   :  { %1208 = vsyncadd [#allocation4], 4294967168 }
 0x330   :  { %840 = vsyncpa [#allocation3], 1 }
 0x331   :  { %841 = vsyncpa [#allocation6], 1 }
 0x332   :  { %842 = vsyncpa [#allocation4], 1 }

</bundles_post_ra>
